<compile_context>
chip_gen: v5e
topology: v5e:2x2
jax: 0.10.0
libtpu: 0.0.40
codegen_flags: <defaults>
</compile_context>

<pallas_src>
import functools

import jax
import jax.numpy as jnp
import numpy as np
from jax import lax
from jax.experimental import pallas as pl
from jax.experimental.pallas import tpu as pltpu


_TILE_B = 512    # rows per tile
_TILE_L = 2048   # cols per tile (512 x 2048 x 4B = 4 MiB per int32 tile)


def _canonical_dtype(dtype):
    """Map 64-bit dtypes to TPU-native 32-bit equivalents."""
    dtype = np.dtype(dtype)
    return {
        np.dtype(np.int64): np.dtype(np.int32),
        np.dtype(np.uint64): np.dtype(np.uint32),
        np.dtype(np.float64): np.dtype(np.float32),
    }.get(dtype, dtype)


def _round_up(n, m):
    return ((n + m - 1) // m) * m


def _sublane_multiple(dtype):
    """Minimum second-to-last-dim block multiple for a given element width."""
    return {4: 8, 2: 16, 1: 32}[np.dtype(dtype).itemsize]


def _pad_mask_kernel(nc_ref, pad_ref, tokens_ref, lengths_ref, out_ref, *, tile_l):
    """out[b, t] = tokens[b, t] if (global t) < lengths[b] else padding_value."""
    del nc_ref                                   # only consumed by the index_maps
    j = pl.program_id(1)                         # *output* column-tile index
    toks = tokens_ref[...]                       # (tile_b, tile_l)
    lens = lengths_ref[...]                      # (tile_b, 1) int32
    col = lax.broadcasted_iota(jnp.int32, toks.shape, 1) + j * tile_l
    pad = pad_ref[0].astype(out_ref.dtype)
    # Emit the requested dtype directly (no trailing astype pass over HBM).
    out_ref[...] = jnp.where(col < lens, toks.astype(out_ref.dtype), pad)


def pad_dense_tokens(tokens, lengths, padding_value, dtype=jnp.int32):
    """Device-resident pad_sequence branch of ToTensor (Pallas kernel).

    tokens : (B, L) integer array; contents at positions >= lengths[b] are
             don't-care.
    lengths: (B,) integer per-row valid lengths (clamped to L).
    Returns a (B, L) array of `dtype` with tail positions set to padding_value.
    """
    dtype = _canonical_dtype(dtype)
    B, L = tokens.shape
    if B == 0 or L == 0:                         # degenerate shapes: no kernel
        return jnp.zeros((B, L), dtype=dtype)

    # Keep tokens in their native 1/2/4-byte dtype (narrow ids halve HBM reads);
    # anything wider is narrowed to int32 once.
    if np.dtype(tokens.dtype).itemsize not in (1, 2, 4):
        tokens = tokens.astype(jnp.int32)

    row_mult = max(_sublane_multiple(tokens.dtype), _sublane_multiple(dtype))

    tile_b = min(_round_up(B, row_mult), _TILE_B)
    tile_l = min(_round_up(L, 128), _TILE_L)
    grid_rows = pl.cdiv(B, tile_b)
    grid_cols = pl.cdiv(L, tile_l)
    # Guarantee >= 2 blocks when possible so the v7x megacore has work for both
    # TensorCores (no effect on single-TC v5e/v6e).
    if grid_rows * grid_cols == 1 and B >= 2 * row_mult:
        tile_b = _round_up(pl.cdiv(B, 2), row_mult)
        grid_rows = pl.cdiv(B, tile_b)

    # pad_sequence assumes lengths <= L; clamp to be safe (tiny (B,) op).
    lens = jnp.minimum(lengths.astype(jnp.int32).reshape(B), L)

    # Per-row-block "number of column tiles that actually contain tokens".
    # Column tiles past this are all-pad: the tokens index_map revisits the
    # last useful block instead of DMA'ing garbage from HBM.
    lens_blocks = jnp.pad(lens, (0, grid_rows * tile_b - B))
    block_max = lens_blocks.reshape(grid_rows, tile_b).max(axis=1)
    needed_cols = jnp.maximum((block_max + (tile_l - 1)) // tile_l, 1).astype(jnp.int32)

    # Pad value travels as an SMEM scalar -> no recompile per distinct pad id.
    if jnp.issubdtype(dtype, jnp.floating):
        pad_arr = jnp.asarray([padding_value], dtype=jnp.float32)
    else:
        pad_arr = jnp.asarray([padding_value], dtype=jnp.int32)

    kernel = functools.partial(_pad_mask_kernel, tile_l=tile_l)

    return pl.pallas_call(
        kernel,
        out_shape=jax.ShapeDtypeStruct((B, L), dtype),
        grid_spec=pltpu.PrefetchScalarGridSpec(
            num_scalar_prefetch=1,               # needed_cols -> SMEM
            grid=(grid_rows, grid_cols),
            in_specs=[
                # Pad value: one scalar in SMEM.
                pl.BlockSpec(memory_space=pltpu.MemorySpace.SMEM),
                # Tokens: clamp the column block index so fully-padded column
                # tiles revisit the previous block (no extra HBM read).
                pl.BlockSpec((tile_b, tile_l),
                             lambda i, j, nc: (i, jnp.minimum(j, nc[i] - 1))),
                # Lengths column: constant block index across the column axis
                # -> revisited, not re-DMA'd, for every column tile.
                pl.BlockSpec((tile_b, 1), lambda i, j, nc: (i, 0)),
            ],
            out_specs=pl.BlockSpec((tile_b, tile_l), lambda i, j, nc: (i, j)),
        ),
        compiler_params=pltpu.CompilerParams(
            dimension_semantics=("parallel", "parallel"),
            vmem_limit_bytes=48 * 1024 * 1024,
        ),
    )(needed_cols, pad_arr, tokens, lens.reshape(B, 1))


def to_tensor(input, padding_value=None, dtype=jnp.int32):
    """JAX equivalent of ToTensor.forward for host Python lists.

    Host-ingested lists are padded during staging (the host already touches
    every element), so this path needs no kernel and no extra HBM pass.  The
    Pallas kernel (`pad_dense_tokens`) covers dense token buffers that already
    live on-device.
    """
    dtype = _canonical_dtype(dtype)

    if isinstance(input, (list, tuple)) and (
            len(input) == 0 or not isinstance(input[0], (list, tuple))):
        # List[int] branch: torch hard-codes torch.long here (not self.dtype);
        # mirrored with the TPU-native int32.
        return jnp.asarray(list(input), dtype=jnp.int32)

    if isinstance(input, (list, tuple)):
        seqs = [list(s) for s in input]
        lengths = [len(s) for s in seqs]
        batch = len(seqs)
        max_len = max(lengths)

        if padding_value is None:
            # torch.tensor(input) requires rectangular input.
            if any(l != max_len for l in lengths):
                raise ValueError("ragged List[List[int]] requires a padding_value")
            return jnp.asarray(seqs, dtype=dtype)

        if max_len == 0:                          # all-empty batch (degenerate)
            return jnp.zeros((batch, 0), dtype=dtype)

        # pad_sequence(batch_first=True): fill the tail with padding_value
        # directly while staging -> single H2D transfer, no device kernel.
        buf = [s + [padding_value] * (max_len - len(s)) for s in seqs]
        return jnp.asarray(buf, dtype=dtype)

    raise TypeError("Input type not supported")


if __name__ == "__main__":
    # Deterministic small example: batch of 4 ragged token-id sequences (seq<=8).
    key = jax.random.PRNGKey(0)
    batch, max_seq, vocab = 4, 8, 100
    lengths = [8, 5, 3, 6]
    full = jax.random.randint(key, (batch, max_seq), 0, vocab, dtype=jnp.int32)
    full_host = np.asarray(jax.device_get(full))
    sequences = [list(map(int, full_host[b, : lengths[b]])) for b in range(batch)]

    PAD = 1  # e.g. a [PAD] token id

    # Reference (pad_sequence batch_first=True semantics).
    ref = np.full((batch, max_seq), PAD, dtype=np.int32)
    for b, s in enumerate(sequences):
        ref[b, : len(s)] = np.asarray(s, dtype=np.int32)

    # 1) Module-equivalent host path (no kernel on the list path).
    out_host = jax.block_until_ready(
        to_tensor(sequences, padding_value=PAD, dtype=jnp.int32))
    assert out_host.shape == (batch, max_seq) and out_host.dtype == jnp.int32
    np.testing.assert_array_equal(np.asarray(out_host), ref)

    # 2) Device-resident path: run the Pallas kernel on the dense buffer
    #    (tail positions past each length are don't-care and get masked to PAD).
    out_dev = pad_dense_tokens(full, jnp.asarray(lengths, dtype=jnp.int32),
                               padding_value=PAD, dtype=jnp.int32)
    out_dev = jax.block_until_ready(out_dev)
    assert out_dev.shape == (batch, max_seq) and out_dev.dtype == jnp.int32
    np.testing.assert_array_equal(np.asarray(out_dev), ref)

    # 3) List[int] branch (no kernel needed).
    single = jax.block_until_ready(to_tensor(sequences[0]))
    np.testing.assert_array_equal(
        np.asarray(single), np.asarray(sequences[0], dtype=np.int32))

    # TODO(synk): torch.long (int64) outputs are mapped to int32 (TPU-native).
    print("KERNEL_OK")
</pallas_src>

<mosaic_0001>
module attributes {stable_mosaic.version = 11 : i64} {
  func.func @_pad_mask_kernel(%arg0: i32, %arg1: i32, %arg2: memref<1xi32, #tpu.memory_space<smem>>, %arg3: memref<1xi32, #tpu.memory_space<smem>>, %arg4: memref<8x128xi32, #tpu.memory_space<vmem>>, %arg5: memref<8x1xi32, #tpu.memory_space<vmem>>, %arg6: memref<8x128xi32, #tpu.memory_space<vmem>>) attributes {dimension_semantics = [#tpu.dimension_semantics<parallel>, #tpu.dimension_semantics<parallel>], iteration_bounds = array<i64: 1, 1>, scalar_prefetch = 1 : i64, scratch_operands = 0 : i64, tpu.core_type = #tpu.core_type<tc>, window_params = [{transform_indices = @transform_0, window_bounds = array<i64: 1>}, {transform_indices = @transform_1, window_bounds = array<i64: 8, 128>}, {transform_indices = @transform_2, window_bounds = array<i64: 8, 1>}, {transform_indices = @transform_3, window_bounds = array<i64: 8, 128>}]} {
    %c0 = arith.constant 0 : index
    %c0_0 = arith.constant 0 : index
    %0 = vector.load %arg4[%c0, %c0_0] : memref<8x128xi32, #tpu.memory_space<vmem>>, vector<8x128xi32>
    %c0_1 = arith.constant 0 : index
    %c0_2 = arith.constant 0 : index
    %1 = vector.load %arg5[%c0_1, %c0_2] : memref<8x1xi32, #tpu.memory_space<vmem>>, vector<8x1xi32>
    %2 = tpu.iota {dimensions = array<i32: 1>} : vector<8x128xi32>
    %c128_i32 = arith.constant 128 : i32
    %3 = arith.muli %arg1, %c128_i32 : i32
    %4 = vector.broadcast %3 : i32 to vector<8x128xi32>
    %5 = arith.addi %2, %4 : vector<8x128xi32>
    %c0_3 = arith.constant 0 : index
    %6 = memref.load %arg3[%c0_3] : memref<1xi32, #tpu.memory_space<smem>>
    %7 = vector.broadcast %1 : vector<8x1xi32> to vector<8x128xi32>
    %8 = arith.cmpi slt, %5, %7 : vector<8x128xi32>
    %9 = vector.broadcast %6 : i32 to vector<8x128xi32>
    %10 = arith.select %8, %0, %9 : vector<8x128xi1>, vector<8x128xi32>
    %c0_4 = arith.constant 0 : index
    %c0_5 = arith.constant 0 : index
    %11 = vector.load %arg6[%c0_4, %c0_5] : memref<8x128xi32, #tpu.memory_space<vmem>>, vector<8x128xi32>
    tpu.vector_store %arg6[%c0_4, %c0_5], %10 {strides = array<i32>} : memref<8x128xi32, #tpu.memory_space<vmem>>, vector<8x128xi32>,
    return
  }
  func.func @transform_0(%arg0: i32, %arg1: i32, %arg2: memref<1xi32, #tpu.memory_space<smem>>) -> i32 {
    %c0_i32 = arith.constant 0 : i32
    %c0_i32_0 = arith.constant 0 : i32
    return %c0_i32 : i32
  }
  func.func @transform_1(%arg0: i32, %arg1: i32, %arg2: memref<1xi32, #tpu.memory_space<smem>>) -> (i32, i32) {
    %0 = arith.index_cast %arg0 : i32 to index
    %1 = memref.load %arg2[%0] : memref<1xi32, #tpu.memory_space<smem>>
    %c1_i32 = arith.constant 1 : i32
    %2 = arith.subi %1, %c1_i32 : i32
    %3 = arith.minsi %arg1, %2 : i32
    %c0_i32 = arith.constant 0 : i32
    return %arg0, %3 : i32, i32
  }
  func.func @transform_2(%arg0: i32, %arg1: i32, %arg2: memref<1xi32, #tpu.memory_space<smem>>) -> (i32, i32) {
    %c0_i32 = arith.constant 0 : i32
    %c0_i32_0 = arith.constant 0 : i32
    return %arg0, %c0_i32 : i32, i32
  }
  func.func @transform_3(%arg0: i32, %arg1: i32, %arg2: memref<1xi32, #tpu.memory_space<smem>>) -> (i32, i32) {
    %c0_i32 = arith.constant 0 : i32
    return %arg0, %arg1 : i32, i32
  }
}

</mosaic_0001>

<bundles_post_ra>
// kernel: tpu_custom_call.1
= control target key start
LH: loop header
LB: loop body
LE: loop exit
PB: predicated region body
PF: predicated region fallthrough
CT: control target
= control target key end

     0   :  { %s170_s0 = inlined_call_operand.<no memory space> [shape: s32[1], index: 0, kind: input, shape index: {}]   ;;  %s171_s1 = inlined_call_operand.<no memory space> [shape: s32[1], index: 1, kind: input, shape index: {}]   ;;  %s172_s2 = inlined_call_operand.vmem [shape: s32[4,8], index: 2, kind: input, shape index: {}]   ;;  %s173_s3 = inlined_call_operand.vmem [shape: s32[4,1], index: 3, kind: input, shape index: {}]   ;;  %s174_s4 = inlined_call_operand.hbm [shape: s32[4,8], index: 4, kind: output, shape index: {}]  }
   0x1   :  { %v51_v0 = vld [vmem:[%s173_s3] sm:$0xff] }
   0x2   :  { %11 = vsyncpa [#allocation6], 0  ;;  %v126_v1 = vmov 0   ;;  %s89_s19 = sadd.s32 4294967295, %s170_s0  ;;  %v52_v2 = vlaneseq  ;;  %v62_v4 = vstv %s171_s1 }
   0x3   :  { %99 = vset.pattern.permute.xlu0 %v126_v1  ;;  %p90_p0 = scmp.gt.s32.totalorder %s89_s19, 0  ;;  %p92_p1 = scmp.lt.s32.totalorder %s89_s19, 0 }
   0x4   :  { %59 = vperm.xlu0 %99, %v51_v0   ;;  %v53_v3 = vand.u32 127, %v52_v2 }
   0x5   :  { %s176_s19 = smov (%p90_p0, %s89_s19), 0 }
   0x6   :  { %s178_s19 = smov (!%p92_p1, %s176_s19), 0 }
   0x7   :  { %s94_s20 = sshll.u32 %s178_s19, 2 }
   0x8   :  { %s45_s23 = scalar_lea.vmem %s172_s2, %s94_s20 }
   0x9   :  { %v50_v5 = vld [vmem:[%s45_s23] sm:$0xff] }
  0x76   :  { %v60_v6 = vpop.permute.xlu0 %59 }
  0x77   :  { %vm61_vm0 = vcmp.lt.s32.totalorder %v53_v3, %v60_v6 }
  0x78   :  { %v63_v7 = vsel %vm61_vm0, %v50_v5, %v62_v4 }
  0x79   :  { %64 = vst [vmem:[#allocation5] sm:$0xff] %v63_v7 }
  0x7a   :  { %68 = vsyncadd [#allocation6], 64  ;;  %s71_s26 = sshll.u32 %s174_s4, 4  ;;  %s127_s27 = smov [#allocation5]   ;;  %s72_s26 = int_to_ptr.hbm [resolvable:$true] %s71_s26 }
  0x7b   :  { %s69_s28 = sshll.u32 %s127_s27, 4  ;;  %s128_s2 = smov 64   ;;  %s70_s28 = int_to_ptr.vmem [resolvable:$true] %s69_s28 }
  0x7c   :  { %s129_s29 = smov 4  }
  0x7d   :  { %77 = dma.vmem_to_hbm [thread:$0]  %s70_s28, 64, %s72_s26, [#allocation6], %s128_s2, %s128_s2, %s129_s29  }
  0x7e   :  { %124 = dma.done.wait [#allocation6], 128  }
  0x7f   :  { %125 = vsyncadd [#allocation6], 4294967168 }
  0x80   :  { %82 = vsyncpa [#allocation6], 1 }

</bundles_post_ra>
